<compile_context>
chip_gen: v7x
topology: tpu7x:2x2x1
jax: 0.10.0
libtpu: 0.0.40
codegen_flags: <defaults>
</compile_context>

<pallas_src>
import functools

import jax
import jax.numpy as jnp
from jax import lax
from jax.experimental import pallas as pl
from jax.experimental.pallas import tpu as pltpu


def _qnet_lstm_kernel(x_ref, h0_ref, c0_ref,
                      w1t_ref, b1_ref,
                      wiht_ref, whht_ref, bg_ref,
                      w2t_ref, b2_ref, w3_ref, b3_ref,
                      out_ref, hout_ref, cout_ref,
                      gx_scr, hs_scr):
    T, Bp, Din = x_ref.shape
    H = h0_ref.shape[1]

    # ---- batched phase 1: linear1 + ReLU, then input half of the LSTM gates ----
    x2d = x_ref[...].reshape(T * Bp, Din)
    h1 = jnp.dot(x2d, w1t_ref[...], preferred_element_type=jnp.float32) + b1_ref[...]
    h1 = jnp.maximum(h1, 0.0)                                         # (T*Bp, H)
    gx = jnp.dot(h1, wiht_ref[...], preferred_element_type=jnp.float32) + bg_ref[...]
    gx_scr[...] = gx.reshape(T, Bp, 4 * H)                            # (T, Bp, 4H)

    # ---- sequential LSTM recurrence: only h @ W_hh^T on the critical path ----
    whh_t = whht_ref[...]                                             # hoisted load (H, 4H)

    def step(t, carry):
        h, c = carry
        gates = gx_scr[t] + jnp.dot(h, whh_t, preferred_element_type=jnp.float32)
        # PyTorch gate order: i, f, g, o
        i_g = jax.nn.sigmoid(gates[:, 0:H])
        f_g = jax.nn.sigmoid(gates[:, H:2 * H])
        g_g = jnp.tanh(gates[:, 2 * H:3 * H])
        o_g = jax.nn.sigmoid(gates[:, 3 * H:4 * H])
        c_new = f_g * c + i_g * g_g
        h_new = o_g * jnp.tanh(c_new)
        hs_scr[t] = h_new
        return (h_new, c_new)

    h_fin, c_fin = lax.fori_loop(0, T, step, (h0_ref[...], c0_ref[...]), unroll=True)
    hout_ref[...] = h_fin
    cout_ref[...] = c_fin

    # ---- batched phase 2: linear2 + ReLU, linear3 as VPU mul + lane reduce ----
    y = hs_scr[...].reshape(T * Bp, H)
    y2 = jnp.dot(y, w2t_ref[...], preferred_element_type=jnp.float32) + b2_ref[...]
    y2 = jnp.maximum(y2, 0.0).reshape(T, Bp, H)
    out_ref[...] = jnp.sum(y2 * w3_ref[...], axis=-1) + b3_ref[...]   # (T, Bp)


def qnetwork_lstm2_forward(params, state, action, last_action, hidden_in):
    """Pallas implementation of QNetworkLSTM2.forward."""
    h0, c0 = hidden_in                                   # each (1, B, H)
    B, T, _ = state.shape
    H = params["w1"].shape[0]

    # concat along feature dim, go sequence-major, pad batch + feature dims
    x = jnp.concatenate([state, action, last_action], axis=-1).astype(jnp.float32)
    Din = x.shape[-1]
    Bp = -(-B // 8) * 8                                  # pad batch to sublane multiple
    Dp = -(-Din // 8) * 8                                # pad features to >= 8
    x = jnp.transpose(x, (1, 0, 2))                      # (T, B, Din)
    x = jnp.pad(x, ((0, 0), (0, Bp - B), (0, Dp - Din)))

    h0p = jnp.pad(h0[0].astype(jnp.float32), ((0, Bp - B), (0, 0)))
    c0p = jnp.pad(c0[0].astype(jnp.float32), ((0, Bp - B), (0, 0)))

    # pre-transposed (in, out) weights, zero-padded where needed, fused gate bias
    w1t = jnp.pad(params["w1"].T, ((0, Dp - Din), (0, 0)))            # (Dp, H)
    wih_t = params["w_ih"].T                                          # (H, 4H)
    whh_t = params["w_hh"].T                                          # (H, 4H)
    b_g = (params["b_ih"] + params["b_hh"])[None, :]                  # (1, 4H)
    w2t = params["w2"].T                                              # (H, H)
    w3b = params["w3"].reshape(1, 1, H)                               # (1, 1, H)
    b3b = params["b3"].reshape(1, 1)                                  # (1, 1)

    vmem = pl.BlockSpec(memory_space=pltpu.MemorySpace.VMEM)

    out, h_fin, c_fin = pl.pallas_call(
        _qnet_lstm_kernel,
        out_shape=(
            jax.ShapeDtypeStruct((T, Bp), jnp.float32),
            jax.ShapeDtypeStruct((Bp, H), jnp.float32),
            jax.ShapeDtypeStruct((Bp, H), jnp.float32),
        ),
        in_specs=[vmem] * 12,
        out_specs=(vmem, vmem, vmem),
        scratch_shapes=[
            pltpu.VMEM((T, Bp, 4 * H), jnp.float32),   # precomputed input gates
            pltpu.VMEM((T, Bp, H), jnp.float32),       # per-step LSTM hidden states
        ],
    )(
        x, h0p, c0p,
        w1t, params["b1"][None, :],
        wih_t, whh_t, b_g,
        w2t, params["b2"][None, :], w3b, b3b,
    )

    # strip padding, back to batch-major (B, T, 1); hidden gets num_layers=1 axis
    q = jnp.transpose(out[:, :B])[..., None]
    return q, (h_fin[:B][None], c_fin[:B][None])


def _reference_forward(params, state, action, last_action, hidden_in):
    """Pure-JAX reference mirroring the PyTorch forward (for validation)."""
    h, c = hidden_in[0][0], hidden_in[1][0]
    x = jnp.concatenate([state, action, last_action], axis=-1)
    x = jnp.transpose(x, (1, 0, 2))
    x = jax.nn.relu(x @ params["w1"].T + params["b1"])
    H = params["w1"].shape[0]
    outs = []
    for t in range(x.shape[0]):
        gates = x[t] @ params["w_ih"].T + params["b_ih"] + h @ params["w_hh"].T + params["b_hh"]
        i_g = jax.nn.sigmoid(gates[:, 0:H])
        f_g = jax.nn.sigmoid(gates[:, H:2 * H])
        g_g = jnp.tanh(gates[:, 2 * H:3 * H])
        o_g = jax.nn.sigmoid(gates[:, 3 * H:4 * H])
        c = f_g * c + i_g * g_g
        h = o_g * jnp.tanh(c)
        outs.append(h)
    y = jnp.stack(outs, axis=0)
    y = jax.nn.relu(y @ params["w2"].T + params["b2"])
    y = y @ params["w3"].T + params["b3"]
    return jnp.transpose(y, (1, 0, 2)), (h[None], c[None])


def init_params(key, state_dim, action_dim, hidden_dim):
    """Deterministic synthetic parameters (PyTorch weight layout: (out, in))."""
    in_dim = state_dim + 2 * action_dim
    ks = jax.random.split(key, 12)
    s = 0.1
    return {
        "w1":   s * jax.random.normal(ks[0], (hidden_dim, in_dim), jnp.float32),
        "b1":   s * jax.random.normal(ks[1], (hidden_dim,), jnp.float32),
        "w_ih": s * jax.random.normal(ks[2], (4 * hidden_dim, hidden_dim), jnp.float32),
        "b_ih": s * jax.random.normal(ks[3], (4 * hidden_dim,), jnp.float32),
        "w_hh": s * jax.random.normal(ks[4], (4 * hidden_dim, hidden_dim), jnp.float32),
        "b_hh": s * jax.random.normal(ks[5], (4 * hidden_dim,), jnp.float32),
        "w2":   s * jax.random.normal(ks[6], (hidden_dim, hidden_dim), jnp.float32),
        "b2":   s * jax.random.normal(ks[7], (hidden_dim,), jnp.float32),
        "w3":   s * jax.random.normal(ks[8], (1, hidden_dim), jnp.float32),
        "b3":   s * jax.random.normal(ks[9], (1,), jnp.float32),
    }


if __name__ == "__main__":
    B, T = 2, 8
    state_dim, action_dim, hidden_dim = 4, 1, 32  # state_space.shape=(4,), num_plant=1

    key = jax.random.PRNGKey(0)
    kp, ks, ka, kl, kh, kc = jax.random.split(key, 6)

    params = init_params(kp, state_dim, action_dim, hidden_dim)
    state = jax.random.normal(ks, (B, T, state_dim), jnp.float32)
    action = jax.random.normal(ka, (B, T, action_dim), jnp.float32)
    last_action = jax.random.normal(kl, (B, T, action_dim), jnp.float32)
    hidden_in = (
        jax.random.normal(kh, (1, B, hidden_dim), jnp.float32),
        jax.random.normal(kc, (1, B, hidden_dim), jnp.float32),
    )

    fwd = jax.jit(functools.partial(qnetwork_lstm2_forward, params))
    q, (h_out, c_out) = fwd(state, action, last_action, hidden_in)
    jax.block_until_ready((q, h_out, c_out))

    q_ref, (h_ref, c_ref) = _reference_forward(params, state, action, last_action, hidden_in)
    assert q.shape == (B, T, 1) and h_out.shape == (1, B, hidden_dim)
    assert jnp.allclose(q, q_ref, atol=1e-4), "Q output mismatch"
    assert jnp.allclose(h_out, h_ref, atol=1e-4), "h_out mismatch"
    assert jnp.allclose(c_out, c_ref, atol=1e-4), "c_out mismatch"

    print("KERNEL_OK")
</pallas_src>

<mosaic_0001>
module attributes {stable_mosaic.version = 11 : i64} {
  func.func @_qnet_lstm_kernel(%arg0: memref<8x8x8xf32, #tpu.memory_space<vmem>>, %arg1: memref<8x32xf32, #tpu.memory_space<vmem>>, %arg2: memref<8x32xf32, #tpu.memory_space<vmem>>, %arg3: memref<8x32xf32, #tpu.memory_space<vmem>>, %arg4: memref<1x32xf32, #tpu.memory_space<vmem>>, %arg5: memref<32x128xf32, #tpu.memory_space<vmem>>, %arg6: memref<32x128xf32, #tpu.memory_space<vmem>>, %arg7: memref<1x128xf32, #tpu.memory_space<vmem>>, %arg8: memref<32x32xf32, #tpu.memory_space<vmem>>, %arg9: memref<1x32xf32, #tpu.memory_space<vmem>>, %arg10: memref<1x1x32xf32, #tpu.memory_space<vmem>>, %arg11: memref<1x1xf32, #tpu.memory_space<vmem>>, %arg12: memref<8x8xf32, #tpu.memory_space<vmem>>, %arg13: memref<8x32xf32, #tpu.memory_space<vmem>>, %arg14: memref<8x32xf32, #tpu.memory_space<vmem>>, %arg15: memref<8x8x128xf32, #tpu.memory_space<vmem>>, %arg16: memref<8x8x32xf32, #tpu.memory_space<vmem>>) attributes {dimension_semantics = [], scalar_prefetch = 0 : i64, scratch_operands = 2 : i64, tpu.core_type = #tpu.core_type<tc>} {
    %c0 = arith.constant 0 : index
    %c0_0 = arith.constant 0 : index
    %c0_1 = arith.constant 0 : index
    %0 = vector.load %arg0[%c0, %c0_0, %c0_1] : memref<8x8x8xf32, #tpu.memory_space<vmem>>, vector<8x8x8xf32>
    %1 = vector.shape_cast %0 : vector<8x8x8xf32> to vector<64x8xf32>
    %c0_2 = arith.constant 0 : index
    %c0_3 = arith.constant 0 : index
    %2 = vector.load %arg3[%c0_2, %c0_3] : memref<8x32xf32, #tpu.memory_space<vmem>>, vector<8x32xf32>
    %cst = arith.constant dense<0.000000e+00> : vector<64x32xf32>
    %3 = tpu.matmul %1, %2, %cst {dimension_numbers = #tpu.dot_dimension_numbers<[1], [0], [0], [1], [0, 0, 1, 1], [], []>} : vector<64x8xf32>, vector<8x32xf32>, vector<64x32xf32> -> vector<64x32xf32>
    %c0_4 = arith.constant 0 : index
    %c0_5 = arith.constant 0 : index
    %4 = vector.load %arg4[%c0_4, %c0_5] : memref<1x32xf32, #tpu.memory_space<vmem>>, vector<1x32xf32>
    %5 = vector.broadcast %4 : vector<1x32xf32> to vector<64x32xf32>
    %6 = arith.addf %3, %5 : vector<64x32xf32>
    %cst_6 = arith.constant 0.000000e+00 : f32
    %7 = vector.broadcast %cst_6 : f32 to vector<64x32xf32>
    %8 = arith.maximumf %6, %7 : vector<64x32xf32>
    %c0_7 = arith.constant 0 : index
    %c0_8 = arith.constant 0 : index
    %9 = vector.load %arg5[%c0_7, %c0_8] : memref<32x128xf32, #tpu.memory_space<vmem>>, vector<32x128xf32>
    %cst_9 = arith.constant dense<0.000000e+00> : vector<64x128xf32>
    %10 = tpu.matmul %8, %9, %cst_9 {dimension_numbers = #tpu.dot_dimension_numbers<[1], [0], [0], [1], [0, 0, 1, 1], [], []>} : vector<64x32xf32>, vector<32x128xf32>, vector<64x128xf32> -> vector<64x128xf32>
    %c0_10 = arith.constant 0 : index
    %c0_11 = arith.constant 0 : index
    %11 = vector.load %arg7[%c0_10, %c0_11] : memref<1x128xf32, #tpu.memory_space<vmem>>, vector<1x128xf32>
    %12 = vector.broadcast %11 : vector<1x128xf32> to vector<64x128xf32>
    %13 = arith.addf %10, %12 : vector<64x128xf32>
    %14 = vector.shape_cast %13 : vector<64x128xf32> to vector<8x8x128xf32>
    %c0_12 = arith.constant 0 : index
    %c0_13 = arith.constant 0 : index
    %c0_14 = arith.constant 0 : index
    %15 = vector.load %arg15[%c0_12, %c0_13, %c0_14] : memref<8x8x128xf32, #tpu.memory_space<vmem>>, vector<8x8x128xf32>
    tpu.vector_store %arg15[%c0_12, %c0_13, %c0_14], %14 {strides = array<i32>} : memref<8x8x128xf32, #tpu.memory_space<vmem>>, vector<8x8x128xf32>,
    %c0_15 = arith.constant 0 : index
    %c0_16 = arith.constant 0 : index
    %16 = vector.load %arg6[%c0_15, %c0_16] : memref<32x128xf32, #tpu.memory_space<vmem>>, vector<32x128xf32>
    %c0_17 = arith.constant 0 : index
    %c0_18 = arith.constant 0 : index
    %17 = vector.load %arg1[%c0_17, %c0_18] : memref<8x32xf32, #tpu.memory_space<vmem>>, vector<8x32xf32>
    %c0_19 = arith.constant 0 : index
    %c0_20 = arith.constant 0 : index
    %18 = vector.load %arg2[%c0_19, %c0_20] : memref<8x32xf32, #tpu.memory_space<vmem>>, vector<8x32xf32>
    %c0_i32 = arith.constant 0 : i32
    %19 = arith.index_cast %c0_i32 : i32 to index
    %c0_21 = arith.constant 0 : index
    %c0_22 = arith.constant 0 : index
    %20 = vector.load %arg15[%19, %c0_21, %c0_22] : memref<8x8x128xf32, #tpu.memory_space<vmem>>, vector<1x8x128xf32>
    %21 = vector.shape_cast %20 : vector<1x8x128xf32> to vector<8x128xf32>
    %cst_23 = arith.constant dense<0.000000e+00> : vector<8x128xf32>
    %22 = tpu.matmul %17, %16, %cst_23 {dimension_numbers = #tpu.dot_dimension_numbers<[1], [0], [0], [1], [0, 0, 1, 1], [], []>} : vector<8x32xf32>, vector<32x128xf32>, vector<8x128xf32> -> vector<8x128xf32>
    %23 = arith.addf %21, %22 : vector<8x128xf32>
    %24 = vector.extract_strided_slice %23 {offsets = [0, 0], sizes = [8, 32], strides = [1, 1]} : vector<8x128xf32> to vector<8x32xf32>
    %25 = arith.negf %24 : vector<8x32xf32>
    %26 = math.exp %25 : vector<8x32xf32>
    %cst_24 = arith.constant 1.000000e+00 : f32
    %27 = vector.broadcast %cst_24 : f32 to vector<8x32xf32>
    %28 = arith.addf %27, %26 : vector<8x32xf32>
    %29 = arith.divf %27, %28 : vector<8x32xf32>
    %30 = vector.extract_strided_slice %23 {offsets = [0, 32], sizes = [8, 32], strides = [1, 1]} : vector<8x128xf32> to vector<8x32xf32>
    %31 = arith.negf %30 : vector<8x32xf32>
    %32 = math.exp %31 : vector<8x32xf32>
    %cst_25 = arith.constant 1.000000e+00 : f32
    %33 = vector.broadcast %cst_25 : f32 to vector<8x32xf32>
    %34 = arith.addf %33, %32 : vector<8x32xf32>
    %35 = arith.divf %33, %34 : vector<8x32xf32>
    %36 = vector.extract_strided_slice %23 {offsets = [0, 64], sizes = [8, 32], strides = [1, 1]} : vector<8x128xf32> to vector<8x32xf32>
    %37 = math.tanh %36 : vector<8x32xf32>
    %38 = vector.extract_strided_slice %23 {offsets = [0, 96], sizes = [8, 32], strides = [1, 1]} : vector<8x128xf32> to vector<8x32xf32>
    %39 = arith.negf %38 : vector<8x32xf32>
    %40 = math.exp %39 : vector<8x32xf32>
    %cst_26 = arith.constant 1.000000e+00 : f32
    %41 = vector.broadcast %cst_26 : f32 to vector<8x32xf32>
    %42 = arith.addf %41, %40 : vector<8x32xf32>
    %43 = arith.divf %41, %42 : vector<8x32xf32>
    %44 = arith.mulf %35, %18 : vector<8x32xf32>
    %45 = arith.mulf %29, %37 : vector<8x32xf32>
    %46 = arith.addf %44, %45 : vector<8x32xf32>
    %47 = math.tanh %46 : vector<8x32xf32>
    %48 = arith.mulf %43, %47 : vector<8x32xf32>
    %49 = arith.index_cast %c0_i32 : i32 to index
    %c0_27 = arith.constant 0 : index
    %c0_28 = arith.constant 0 : index
    %50 = vector.load %arg16[%49, %c0_27, %c0_28] : memref<8x8x32xf32, #tpu.memory_space<vmem>>, vector<1x8x32xf32>
    %51 = vector.shape_cast %50 : vector<1x8x32xf32> to vector<8x32xf32>
    %52 = vector.shape_cast %48 : vector<8x32xf32> to vector<1x8x32xf32>
    tpu.vector_store %arg16[%49, %c0_27, %c0_28], %52 {strides = array<i32>} : memref<8x8x32xf32, #tpu.memory_space<vmem>>, vector<1x8x32xf32>,
    %c1_i32 = arith.constant 1 : i32
    %53 = arith.index_cast %c1_i32 : i32 to index
    %c0_29 = arith.constant 0 : index
    %c0_30 = arith.constant 0 : index
    %54 = vector.load %arg15[%53, %c0_29, %c0_30] : memref<8x8x128xf32, #tpu.memory_space<vmem>>, vector<1x8x128xf32>
    %55 = vector.shape_cast %54 : vector<1x8x128xf32> to vector<8x128xf32>
    %cst_31 = arith.constant dense<0.000000e+00> : vector<8x128xf32>
    %56 = tpu.matmul %48, %16, %cst_31 {dimension_numbers = #tpu.dot_dimension_numbers<[1], [0], [0], [1], [0, 0, 1, 1], [], []>} : vector<8x32xf32>, vector<32x128xf32>, vector<8x128xf32> -> vector<8x128xf32>
    %57 = arith.addf %55, %56 : vector<8x128xf32>
    %58 = vector.extract_strided_slice %57 {offsets = [0, 0], sizes = [8, 32], strides = [1, 1]} : vector<8x128xf32> to vector<8x32xf32>
    %59 = arith.negf %58 : vector<8x32xf32>
    %60 = math.exp %59 : vector<8x32xf32>
    %cst_32 = arith.constant 1.000000e+00 : f32
    %61 = vector.broadcast %cst_32 : f32 to vector<8x32xf32>
    %62 = arith.addf %61, %60 : vector<8x32xf32>
    %63 = arith.divf %61, %62 : vector<8x32xf32>
    %64 = vector.extract_strided_slice %57 {offsets = [0, 32], sizes = [8, 32], strides = [1, 1]} : vector<8x128xf32> to vector<8x32xf32>
    %65 = arith.negf %64 : vector<8x32xf32>
    %66 = math.exp %65 : vector<8x32xf32>
    %cst_33 = arith.constant 1.000000e+00 : f32
    %67 = vector.broadcast %cst_33 : f32 to vector<8x32xf32>
    %68 = arith.addf %67, %66 : vector<8x32xf32>
    %69 = arith.divf %67, %68 : vector<8x32xf32>
    %70 = vector.extract_strided_slice %57 {offsets = [0, 64], sizes = [8, 32], strides = [1, 1]} : vector<8x128xf32> to vector<8x32xf32>
    %71 = math.tanh %70 : vector<8x32xf32>
    %72 = vector.extract_strided_slice %57 {offsets = [0, 96], sizes = [8, 32], strides = [1, 1]} : vector<8x128xf32> to vector<8x32xf32>
    %73 = arith.negf %72 : vector<8x32xf32>
    %74 = math.exp %73 : vector<8x32xf32>
    %cst_34 = arith.constant 1.000000e+00 : f32
    %75 = vector.broadcast %cst_34 : f32 to vector<8x32xf32>
    %76 = arith.addf %75, %74 : vector<8x32xf32>
    %77 = arith.divf %75, %76 : vector<8x32xf32>
    %78 = arith.mulf %69, %46 : vector<8x32xf32>
    %79 = arith.mulf %63, %71 : vector<8x32xf32>
    %80 = arith.addf %78, %79 : vector<8x32xf32>
    %81 = math.tanh %80 : vector<8x32xf32>
    %82 = arith.mulf %77, %81 : vector<8x32xf32>
    %83 = arith.index_cast %c1_i32 : i32 to index
    %c0_35 = arith.constant 0 : index
    %c0_36 = arith.constant 0 : index
    %84 = vector.load %arg16[%83, %c0_35, %c0_36] : memref<8x8x32xf32, #tpu.memory_space<vmem>>, vector<1x8x32xf32>
    %85 = vector.shape_cast %84 : vector<1x8x32xf32> to vector<8x32xf32>
    %86 = vector.shape_cast %82 : vector<8x32xf32> to vector<1x8x32xf32>
    tpu.vector_store %arg16[%83, %c0_35, %c0_36], %86 {strides = array<i32>} : memref<8x8x32xf32, #tpu.memory_space<vmem>>, vector<1x8x32xf32>,
    %c2_i32 = arith.constant 2 : i32
    %87 = arith.index_cast %c2_i32 : i32 to index
    %c0_37 = arith.constant 0 : index
    %c0_38 = arith.constant 0 : index
    %88 = vector.load %arg15[%87, %c0_37, %c0_38] : memref<8x8x128xf32, #tpu.memory_space<vmem>>, vector<1x8x128xf32>
    %89 = vector.shape_cast %88 : vector<1x8x128xf32> to vector<8x128xf32>
    %cst_39 = arith.constant dense<0.000000e+00> : vector<8x128xf32>
    %90 = tpu.matmul %82, %16, %cst_39 {dimension_numbers = #tpu.dot_dimension_numbers<[1], [0], [0], [1], [0, 0, 1, 1], [], []>} : vector<8x32xf32>, vector<32x128xf32>, vector<8x128xf32> -> vector<8x128xf32>
    %91 = arith.addf %89, %90 : vector<8x128xf32>
    %92 = vector.extract_strided_slice %91 {offsets = [0, 0], sizes = [8, 32], strides = [1, 1]} : vector<8x128xf32> to vector<8x32xf32>
    %93 = arith.negf %92 : vector<8x32xf32>
    %94 = math.exp %93 : vector<8x32xf32>
    %cst_40 = arith.constant 1.000000e+00 : f32
    %95 = vector.broadcast %cst_40 : f32 to vector<8x32xf32>
    %96 = arith.addf %95, %94 : vector<8x32xf32>
    %97 = arith.divf %95, %96 : vector<8x32xf32>
    %98 = vector.extract_strided_slice %91 {offsets = [0, 32], sizes = [8, 32], strides = [1, 1]} : vector<8x128xf32> to vector<8x32xf32>
    %99 = arith.negf %98 : vector<8x32xf32>
    %100 = math.exp %99 : vector<8x32xf32>
    %cst_41 = arith.constant 1.000000e+00 : f32
    %101 = vector.broadcast %cst_41 : f32 to vector<8x32xf32>
    %102 = arith.addf %101, %100 : vector<8x32xf32>
    %103 = arith.divf %101, %102 : vector<8x32xf32>
    %104 = vector.extract_strided_slice %91 {offsets = [0, 64], sizes = [8, 32], strides = [1, 1]} : vector<8x128xf32> to vector<8x32xf32>
    %105 = math.tanh %104 : vector<8x32xf32>
    %106 = vector.extract_strided_slice %91 {offsets = [0, 96], sizes = [8, 32], strides = [1, 1]} : vector<8x128xf32> to vector<8x32xf32>
    %107 = arith.negf %106 : vector<8x32xf32>
    %108 = math.exp %107 : vector<8x32xf32>
    %cst_42 = arith.constant 1.000000e+00 : f32
    %109 = vector.broadcast %cst_42 : f32 to vector<8x32xf32>
    %110 = arith.addf %109, %108 : vector<8x32xf32>
    %111 = arith.divf %109, %110 : vector<8x32xf32>
    %112 = arith.mulf %103, %80 : vector<8x32xf32>
    %113 = arith.mulf %97, %105 : vector<8x32xf32>
    %114 = arith.addf %112, %113 : vector<8x32xf32>
    %115 = math.tanh %114 : vector<8x32xf32>
    %116 = arith.mulf %111, %115 : vector<8x32xf32>
    %117 = arith.index_cast %c2_i32 : i32 to index
    %c0_43 = arith.constant 0 : index
    %c0_44 = arith.constant 0 : index
    %118 = vector.load %arg16[%117, %c0_43, %c0_44] : memref<8x8x32xf32, #tpu.memory_space<vmem>>, vector<1x8x32xf32>
    %119 = vector.shape_cast %118 : vector<1x8x32xf32> to vector<8x32xf32>
    %120 = vector.shape_cast %116 : vector<8x32xf32> to vector<1x8x32xf32>
    tpu.vector_store %arg16[%117, %c0_43, %c0_44], %120 {strides = array<i32>} : memref<8x8x32xf32, #tpu.memory_space<vmem>>, vector<1x8x32xf32>,
    %c3_i32 = arith.constant 3 : i32
    %121 = arith.index_cast %c3_i32 : i32 to index
    %c0_45 = arith.constant 0 : index
    %c0_46 = arith.constant 0 : index
    %122 = vector.load %arg15[%121, %c0_45, %c0_46] : memref<8x8x128xf32, #tpu.memory_space<vmem>>, vector<1x8x128xf32>
    %123 = vector.shape_cast %122 : vector<1x8x128xf32> to vector<8x128xf32>
    %cst_47 = arith.constant dense<0.000000e+00> : vector<8x128xf32>
    %124 = tpu.matmul %116, %16, %cst_47 {dimension_numbers = #tpu.dot_dimension_numbers<[1], [0], [0], [1], [0, 0, 1, 1], [], []>} : vector<8x32xf32>, vector<32x128xf32>, vector<8x128xf32> -> vector<8x128xf32>
    %125 = arith.addf %123, %124 : vector<8x128xf32>
    %126 = vector.extract_strided_slice %125 {offsets = [0, 0], sizes = [8, 32], strides = [1, 1]} : vector<8x128xf32> to vector<8x32xf32>
    %127 = arith.negf %126 : vector<8x32xf32>
    %128 = math.exp %127 : vector<8x32xf32>
    %cst_48 = arith.constant 1.000000e+00 : f32
    %129 = vector.broadcast %cst_48 : f32 to vector<8x32xf32>
    %130 = arith.addf %129, %128 : vector<8x32xf32>
    %131 = arith.divf %129, %130 : vector<8x32xf32>
    %132 = vector.extract_strided_slice %125 {offsets = [0, 32], sizes = [8, 32], strides = [1, 1]} : vector<8x128xf32> to vector<8x32xf32>
    %133 = arith.negf %132 : vector<8x32xf32>
    %134 = math.exp %133 : vector<8x32xf32>
    %cst_49 = arith.constant 1.000000e+00 : f32
    %135 = vector.broadcast %cst_49 : f32 to vector<8x32xf32>
    %136 = arith.addf %135, %134 : vector<8x32xf32>
    %137 = arith.divf %135, %136 : vector<8x32xf32>
    %138 = vector.extract_strided_slice %125 {offsets = [0, 64], sizes = [8, 32], strides = [1, 1]} : vector<8x128xf32> to vector<8x32xf32>
    %139 = math.tanh %138 : vector<8x32xf32>
    %140 = vector.extract_strided_slice %125 {offsets = [0, 96], sizes = [8, 32], strides = [1, 1]} : vector<8x128xf32> to vector<8x32xf32>
    %141 = arith.negf %140 : vector<8x32xf32>
    %142 = math.exp %141 : vector<8x32xf32>
    %cst_50 = arith.constant 1.000000e+00 : f32
    %143 = vector.broadcast %cst_50 : f32 to vector<8x32xf32>
    %144 = arith.addf %143, %142 : vector<8x32xf32>
    %145 = arith.divf %143, %144 : vector<8x32xf32>
    %146 = arith.mulf %137, %114 : vector<8x32xf32>
    %147 = arith.mulf %131, %139 : vector<8x32xf32>
    %148 = arith.addf %146, %147 : vector<8x32xf32>
    %149 = math.tanh %148 : vector<8x32xf32>
    %150 = arith.mulf %145, %149 : vector<8x32xf32>
    %151 = arith.index_cast %c3_i32 : i32 to index
    %c0_51 = arith.constant 0 : index
    %c0_52 = arith.constant 0 : index
    %152 = vector.load %arg16[%151, %c0_51, %c0_52] : memref<8x8x32xf32, #tpu.memory_space<vmem>>, vector<1x8x32xf32>
    %153 = vector.shape_cast %152 : vector<1x8x32xf32> to vector<8x32xf32>
    %154 = vector.shape_cast %150 : vector<8x32xf32> to vector<1x8x32xf32>
    tpu.vector_store %arg16[%151, %c0_51, %c0_52], %154 {strides = array<i32>} : memref<8x8x32xf32, #tpu.memory_space<vmem>>, vector<1x8x32xf32>,
    %c4_i32 = arith.constant 4 : i32
    %155 = arith.index_cast %c4_i32 : i32 to index
    %c0_53 = arith.constant 0 : index
    %c0_54 = arith.constant 0 : index
    %156 = vector.load %arg15[%155, %c0_53, %c0_54] : memref<8x8x128xf32, #tpu.memory_space<vmem>>, vector<1x8x128xf32>
    %157 = vector.shape_cast %156 : vector<1x8x128xf32> to vector<8x128xf32>
    %cst_55 = arith.constant dense<0.000000e+00> : vector<8x128xf32>
    %158 = tpu.matmul %150, %16, %cst_55 {dimension_numbers = #tpu.dot_dimension_numbers<[1], [0], [0], [1], [0, 0, 1, 1], [], []>} : vector<8x32xf32>, vector<32x128xf32>, vector<8x128xf32> -> vector<8x128xf32>
    %159 = arith.addf %157, %158 : vector<8x128xf32>
    %160 = vector.extract_strided_slice %159 {offsets = [0, 0], sizes = [8, 32], strides = [1, 1]} : vector<8x128xf32> to vector<8x32xf32>
    %161 = arith.negf %160 : vector<8x32xf32>
    %162 = math.exp %161 : vector<8x32xf32>
    %cst_56 = arith.constant 1.000000e+00 : f32
    %163 = vector.broadcast %cst_56 : f32 to vector<8x32xf32>
    %164 = arith.addf %163, %162 : vector<8x32xf32>
    %165 = arith.divf %163, %164 : vector<8x32xf32>
    %166 = vector.extract_strided_slice %159 {offsets = [0, 32], sizes = [8, 32], strides = [1, 1]} : vector<8x128xf32> to vector<8x32xf32>
    %167 = arith.negf %166 : vector<8x32xf32>
    %168 = math.exp %167 : vector<8x32xf32>
    %cst_57 = arith.constant 1.000000e+00 : f32
    %169 = vector.broadcast %cst_57 : f32 to vector<8x32xf32>
    %170 = arith.addf %169, %168 : vector<8x32xf32>
    %171 = arith.divf %169, %170 : vector<8x32xf32>
    %172 = vector.extract_strided_slice %159 {offsets = [0, 64], sizes = [8, 32], strides = [1, 1]} : vector<8x128xf32> to vector<8x32xf32>
    %173 = math.tanh %172 : vector<8x32xf32>
    %174 = vector.extract_strided_slice %159 {offsets = [0, 96], sizes = [8, 32], strides = [1, 1]} : vector<8x128xf32> to vector<8x32xf32>
    %175 = arith.negf %174 : vector<8x32xf32>
    %176 = math.exp %175 : vector<8x32xf32>
    %cst_58 = arith.constant 1.000000e+00 : f32
    %177 = vector.broadcast %cst_58 : f32 to vector<8x32xf32>
    %178 = arith.addf %177, %176 : vector<8x32xf32>
    %179 = arith.divf %177, %178 : vector<8x32xf32>
    %180 = arith.mulf %171, %148 : vector<8x32xf32>
    %181 = arith.mulf %165, %173 : vector<8x32xf32>
    %182 = arith.addf %180, %181 : vector<8x32xf32>
    %183 = math.tanh %182 : vector<8x32xf32>
    %184 = arith.mulf %179, %183 : vector<8x32xf32>
    %185 = arith.index_cast %c4_i32 : i32 to index
    %c0_59 = arith.constant 0 : index
    %c0_60 = arith.constant 0 : index
    %186 = vector.load %arg16[%185, %c0_59, %c0_60] : memref<8x8x32xf32, #tpu.memory_space<vmem>>, vector<1x8x32xf32>
    %187 = vector.shape_cast %186 : vector<1x8x32xf32> to vector<8x32xf32>
    %188 = vector.shape_cast %184 : vector<8x32xf32> to vector<1x8x32xf32>
    tpu.vector_store %arg16[%185, %c0_59, %c0_60], %188 {strides = array<i32>} : memref<8x8x32xf32, #tpu.memory_space<vmem>>, vector<1x8x32xf32>,
    %c5_i32 = arith.constant 5 : i32
    %189 = arith.index_cast %c5_i32 : i32 to index
    %c0_61 = arith.constant 0 : index
    %c0_62 = arith.constant 0 : index
    %190 = vector.load %arg15[%189, %c0_61, %c0_62] : memref<8x8x128xf32, #tpu.memory_space<vmem>>, vector<1x8x128xf32>
    %191 = vector.shape_cast %190 : vector<1x8x128xf32> to vector<8x128xf32>
    %cst_63 = arith.constant dense<0.000000e+00> : vector<8x128xf32>
    %192 = tpu.matmul %184, %16, %cst_63 {dimension_numbers = #tpu.dot_dimension_numbers<[1], [0], [0], [1], [0, 0, 1, 1], [], []>} : vector<8x32xf32>, vector<32x128xf32>, vector<8x128xf32> -> vector<8x128xf32>
    %193 = arith.addf %191, %192 : vector<8x128xf32>
    %194 = vector.extract_strided_slice %193 {offsets = [0, 0], sizes = [8, 32], strides = [1, 1]} : vector<8x128xf32> to vector<8x32xf32>
    %195 = arith.negf %194 : vector<8x32xf32>
    %196 = math.exp %195 : vector<8x32xf32>
    %cst_64 = arith.constant 1.000000e+00 : f32
    %197 = vector.broadcast %cst_64 : f32 to vector<8x32xf32>
    %198 = arith.addf %197, %196 : vector<8x32xf32>
    %199 = arith.divf %197, %198 : vector<8x32xf32>
    %200 = vector.extract_strided_slice %193 {offsets = [0, 32], sizes = [8, 32], strides = [1, 1]} : vector<8x128xf32> to vector<8x32xf32>
    %201 = arith.negf %200 : vector<8x32xf32>
    %202 = math.exp %201 : vector<8x32xf32>
    %cst_65 = arith.constant 1.000000e+00 : f32
    %203 = vector.broadcast %cst_65 : f32 to vector<8x32xf32>
    %204 = arith.addf %203, %202 : vector<8x32xf32>
    %205 = arith.divf %203, %204 : vector<8x32xf32>
    %206 = vector.extract_strided_slice %193 {offsets = [0, 64], sizes = [8, 32], strides = [1, 1]} : vector<8x128xf32> to vector<8x32xf32>
    %207 = math.tanh %206 : vector<8x32xf32>
    %208 = vector.extract_strided_slice %193 {offsets = [0, 96], sizes = [8, 32], strides = [1, 1]} : vector<8x128xf32> to vector<8x32xf32>
    %209 = arith.negf %208 : vector<8x32xf32>
    %210 = math.exp %209 : vector<8x32xf32>
    %cst_66 = arith.constant 1.000000e+00 : f32
    %211 = vector.broadcast %cst_66 : f32 to vector<8x32xf32>
    %212 = arith.addf %211, %210 : vector<8x32xf32>
    %213 = arith.divf %211, %212 : vector<8x32xf32>
    %214 = arith.mulf %205, %182 : vector<8x32xf32>
    %215 = arith.mulf %199, %207 : vector<8x32xf32>
    %216 = arith.addf %214, %215 : vector<8x32xf32>
    %217 = math.tanh %216 : vector<8x32xf32>
    %218 = arith.mulf %213, %217 : vector<8x32xf32>
    %219 = arith.index_cast %c5_i32 : i32 to index
    %c0_67 = arith.constant 0 : index
    %c0_68 = arith.constant 0 : index
    %220 = vector.load %arg16[%219, %c0_67, %c0_68] : memref<8x8x32xf32, #tpu.memory_space<vmem>>, vector<1x8x32xf32>
    %221 = vector.shape_cast %220 : vector<1x8x32xf32> to vector<8x32xf32>
    %222 = vector.shape_cast %218 : vector<8x32xf32> to vector<1x8x32xf32>
    tpu.vector_store %arg16[%219, %c0_67, %c0_68], %222 {strides = array<i32>} : memref<8x8x32xf32, #tpu.memory_space<vmem>>, vector<1x8x32xf32>,
    %c6_i32 = arith.constant 6 : i32
    %223 = arith.index_cast %c6_i32 : i32 to index
    %c0_69 = arith.constant 0 : index
    %c0_70 = arith.constant 0 : index
    %224 = vector.load %arg15[%223, %c0_69, %c0_70] : memref<8x8x128xf32, #tpu.memory_space<vmem>>, vector<1x8x128xf32>
    %225 = vector.shape_cast %224 : vector<1x8x128xf32> to vector<8x128xf32>
    %cst_71 = arith.constant dense<0.000000e+00> : vector<8x128xf32>
    %226 = tpu.matmul %218, %16, %cst_71 {dimension_numbers = #tpu.dot_dimension_numbers<[1], [0], [0], [1], [0, 0, 1, 1], [], []>} : vector<8x32xf32>, vector<32x128xf32>, vector<8x128xf32> -> vector<8x128xf32>
    %227 = arith.addf %225, %226 : vector<8x128xf32>
    %228 = vector.extract_strided_slice %227 {offsets = [0, 0], sizes = [8, 32], strides = [1, 1]} : vector<8x128xf32> to vector<8x32xf32>
    %229 = arith.negf %228 : vector<8x32xf32>
    %230 = math.exp %229 : vector<8x32xf32>
    %cst_72 = arith.constant 1.000000e+00 : f32
    %231 = vector.broadcast %cst_72 : f32 to vector<8x32xf32>
    %232 = arith.addf %231, %230 : vector<8x32xf32>
    %233 = arith.divf %231, %232 : vector<8x32xf32>
    %234 = vector.extract_strided_slice %227 {offsets = [0, 32], sizes = [8, 32], strides = [1, 1]} : vector<8x128xf32> to vector<8x32xf32>
    %235 = arith.negf %234 : vector<8x32xf32>
    %236 = math.exp %235 : vector<8x32xf32>
    %cst_73 = arith.constant 1.000000e+00 : f32
    %237 = vector.broadcast %cst_73 : f32 to vector<8x32xf32>
    %238 = arith.addf %237, %236 : vector<8x32xf32>
    %239 = arith.divf %237, %238 : vector<8x32xf32>
    %240 = vector.extract_strided_slice %227 {offsets = [0, 64], sizes = [8, 32], strides = [1, 1]} : vector<8x128xf32> to vector<8x32xf32>
    %241 = math.tanh %240 : vector<8x32xf32>
    %242 = vector.extract_strided_slice %227 {offsets = [0, 96], sizes = [8, 32], strides = [1, 1]} : vector<8x128xf32> to vector<8x32xf32>
    %243 = arith.negf %242 : vector<8x32xf32>
    %244 = math.exp %243 : vector<8x32xf32>
    %cst_74 = arith.constant 1.000000e+00 : f32
    %245 = vector.broadcast %cst_74 : f32 to vector<8x32xf32>
    %246 = arith.addf %245, %244 : vector<8x32xf32>
    %247 = arith.divf %245, %246 : vector<8x32xf32>
    %248 = arith.mulf %239, %216 : vector<8x32xf32>
    %249 = arith.mulf %233, %241 : vector<8x32xf32>
    %250 = arith.addf %248, %249 : vector<8x32xf32>
    %251 = math.tanh %250 : vector<8x32xf32>
    %252 = arith.mulf %247, %251 : vector<8x32xf32>
    %253 = arith.index_cast %c6_i32 : i32 to index
    %c0_75 = arith.constant 0 : index
    %c0_76 = arith.constant 0 : index
    %254 = vector.load %arg16[%253, %c0_75, %c0_76] : memref<8x8x32xf32, #tpu.memory_space<vmem>>, vector<1x8x32xf32>
    %255 = vector.shape_cast %254 : vector<1x8x32xf32> to vector<8x32xf32>
    %256 = vector.shape_cast %252 : vector<8x32xf32> to vector<1x8x32xf32>
    tpu.vector_store %arg16[%253, %c0_75, %c0_76], %256 {strides = array<i32>} : memref<8x8x32xf32, #tpu.memory_space<vmem>>, vector<1x8x32xf32>,
    %c7_i32 = arith.constant 7 : i32
    %257 = arith.index_cast %c7_i32 : i32 to index
    %c0_77 = arith.constant 0 : index
    %c0_78 = arith.constant 0 : index
    %258 = vector.load %arg15[%257, %c0_77, %c0_78] : memref<8x8x128xf32, #tpu.memory_space<vmem>>, vector<1x8x128xf32>
    %259 = vector.shape_cast %258 : vector<1x8x128xf32> to vector<8x128xf32>
    %cst_79 = arith.constant dense<0.000000e+00> : vector<8x128xf32>
    %260 = tpu.matmul %252, %16, %cst_79 {dimension_numbers = #tpu.dot_dimension_numbers<[1], [0], [0], [1], [0, 0, 1, 1], [], []>} : vector<8x32xf32>, vector<32x128xf32>, vector<8x128xf32> -> vector<8x128xf32>
    %261 = arith.addf %259, %260 : vector<8x128xf32>
    %262 = vector.extract_strided_slice %261 {offsets = [0, 0], sizes = [8, 32], strides = [1, 1]} : vector<8x128xf32> to vector<8x32xf32>
    %263 = arith.negf %262 : vector<8x32xf32>
    %264 = math.exp %263 : vector<8x32xf32>
    %cst_80 = arith.constant 1.000000e+00 : f32
    %265 = vector.broadcast %cst_80 : f32 to vector<8x32xf32>
    %266 = arith.addf %265, %264 : vector<8x32xf32>
    %267 = arith.divf %265, %266 : vector<8x32xf32>
    %268 = vector.extract_strided_slice %261 {offsets = [0, 32], sizes = [8, 32], strides = [1, 1]} : vector<8x128xf32> to vector<8x32xf32>
    %269 = arith.negf %268 : vector<8x32xf32>
    %270 = math.exp %269 : vector<8x32xf32>
    %cst_81 = arith.constant 1.000000e+00 : f32
    %271 = vector.broadcast %cst_81 : f32 to vector<8x32xf32>
    %272 = arith.addf %271, %270 : vector<8x32xf32>
    %273 = arith.divf %271, %272 : vector<8x32xf32>
    %274 = vector.extract_strided_slice %261 {offsets = [0, 64], sizes = [8, 32], strides = [1, 1]} : vector<8x128xf32> to vector<8x32xf32>
    %275 = math.tanh %274 : vector<8x32xf32>
    %276 = vector.extract_strided_slice %261 {offsets = [0, 96], sizes = [8, 32], strides = [1, 1]} : vector<8x128xf32> to vector<8x32xf32>
    %277 = arith.negf %276 : vector<8x32xf32>
    %278 = math.exp %277 : vector<8x32xf32>
    %cst_82 = arith.constant 1.000000e+00 : f32
    %279 = vector.broadcast %cst_82 : f32 to vector<8x32xf32>
    %280 = arith.addf %279, %278 : vector<8x32xf32>
    %281 = arith.divf %279, %280 : vector<8x32xf32>
    %282 = arith.mulf %273, %250 : vector<8x32xf32>
    %283 = arith.mulf %267, %275 : vector<8x32xf32>
    %284 = arith.addf %282, %283 : vector<8x32xf32>
    %285 = math.tanh %284 : vector<8x32xf32>
    %286 = arith.mulf %281, %285 : vector<8x32xf32>
    %287 = arith.index_cast %c7_i32 : i32 to index
    %c0_83 = arith.constant 0 : index
    %c0_84 = arith.constant 0 : index
    %288 = vector.load %arg16[%287, %c0_83, %c0_84] : memref<8x8x32xf32, #tpu.memory_space<vmem>>, vector<1x8x32xf32>
    %289 = vector.shape_cast %288 : vector<1x8x32xf32> to vector<8x32xf32>
    %290 = vector.shape_cast %286 : vector<8x32xf32> to vector<1x8x32xf32>
    tpu.vector_store %arg16[%287, %c0_83, %c0_84], %290 {strides = array<i32>} : memref<8x8x32xf32, #tpu.memory_space<vmem>>, vector<1x8x32xf32>,
    %c8_i32 = arith.constant 8 : i32
    %c0_85 = arith.constant 0 : index
    %c0_86 = arith.constant 0 : index
    %291 = vector.load %arg13[%c0_85, %c0_86] : memref<8x32xf32, #tpu.memory_space<vmem>>, vector<8x32xf32>
    tpu.vector_store %arg13[%c0_85, %c0_86], %286 {strides = array<i32>} : memref<8x32xf32, #tpu.memory_space<vmem>>, vector<8x32xf32>,
    %c0_87 = arith.constant 0 : index
    %c0_88 = arith.constant 0 : index
    %292 = vector.load %arg14[%c0_87, %c0_88] : memref<8x32xf32, #tpu.memory_space<vmem>>, vector<8x32xf32>
    tpu.vector_store %arg14[%c0_87, %c0_88], %284 {strides = array<i32>} : memref<8x32xf32, #tpu.memory_space<vmem>>, vector<8x32xf32>,
    %c0_89 = arith.constant 0 : index
    %c0_90 = arith.constant 0 : index
    %c0_91 = arith.constant 0 : index
    %293 = vector.load %arg16[%c0_89, %c0_90, %c0_91] : memref<8x8x32xf32, #tpu.memory_space<vmem>>, vector<8x8x32xf32>
    %294 = vector.shape_cast %293 : vector<8x8x32xf32> to vector<64x32xf32>
    %c0_92 = arith.constant 0 : index
    %c0_93 = arith.constant 0 : index
    %295 = vector.load %arg8[%c0_92, %c0_93] : memref<32x32xf32, #tpu.memory_space<vmem>>, vector<32x32xf32>
    %cst_94 = arith.constant dense<0.000000e+00> : vector<64x32xf32>
    %296 = tpu.matmul %294, %295, %cst_94 {dimension_numbers = #tpu.dot_dimension_numbers<[1], [0], [0], [1], [0, 0, 1, 1], [], []>} : vector<64x32xf32>, vector<32x32xf32>, vector<64x32xf32> -> vector<64x32xf32>
    %c0_95 = arith.constant 0 : index
    %c0_96 = arith.constant 0 : index
    %297 = vector.load %arg9[%c0_95, %c0_96] : memref<1x32xf32, #tpu.memory_space<vmem>>, vector<1x32xf32>
    %298 = vector.broadcast %297 : vector<1x32xf32> to vector<64x32xf32>
    %299 = arith.addf %296, %298 : vector<64x32xf32>
    %cst_97 = arith.constant 0.000000e+00 : f32
    %300 = vector.broadcast %cst_97 : f32 to vector<64x32xf32>
    %301 = arith.maximumf %299, %300 : vector<64x32xf32>
    %302 = vector.shape_cast %301 : vector<64x32xf32> to vector<8x8x32xf32>
    %c0_98 = arith.constant 0 : index
    %c0_99 = arith.constant 0 : index
    %c0_100 = arith.constant 0 : index
    %303 = vector.load %arg10[%c0_98, %c0_99, %c0_100] : memref<1x1x32xf32, #tpu.memory_space<vmem>>, vector<1x1x32xf32>
    %304 = vector.broadcast %303 : vector<1x1x32xf32> to vector<8x8x32xf32>
    %305 = arith.mulf %302, %304 : vector<8x8x32xf32>
    %cst_101 = arith.constant dense<0.000000e+00> : vector<8x8xf32>
    %306 = vector.multi_reduction <add>, %305, %cst_101 [2] : vector<8x8x32xf32> to vector<8x8xf32>
    %c0_102 = arith.constant 0 : index
    %c0_103 = arith.constant 0 : index
    %307 = vector.load %arg11[%c0_102, %c0_103] : memref<1x1xf32, #tpu.memory_space<vmem>>, vector<1x1xf32>
    %308 = vector.broadcast %307 : vector<1x1xf32> to vector<8x8xf32>
    %309 = arith.addf %306, %308 : vector<8x8xf32>
    %c0_104 = arith.constant 0 : index
    %c0_105 = arith.constant 0 : index
    %310 = vector.load %arg12[%c0_104, %c0_105] : memref<8x8xf32, #tpu.memory_space<vmem>>, vector<8x8xf32>
    tpu.vector_store %arg12[%c0_104, %c0_105], %309 {strides = array<i32>} : memref<8x8xf32, #tpu.memory_space<vmem>>, vector<8x8xf32>,
    return
  }
}

</mosaic_0001>

<bundles_post_ra>
// kernel: qnetwork_lstm2_forward.1
= control target key start
LH: loop header
LB: loop body
LE: loop exit
PB: predicated region body
PF: predicated region fallthrough
CT: control target
= control target key end

     0   :  { %vm62_vm0 = vcmask 64512   ;;  %v1885_v17 = vmov 0.0|0.0   ;;  %vm211_vm1 = vcmask 261120   ;;  %vm1886_vm2 = vmmov 0   ;;  %s1888_s30 = smov 64   ;;  %s1889_s16 = smov 32   ;;  %s2237_s3 = inlined_call_operand.vmem [shape: f32[8,32], index: 3, kind: input, shape index: {}]   ;;  %s2238_s0 = inlined_call_operand.vmem [shape: f32[8,8,8], index: 0, kind: input, shape index: {}]   ;;  %s2239_s5 = inlined_call_operand.vmem [shape: f32[32,128], index: 5, kind: input, shape index: {}]   ;;  %s2240_s6 = inlined_call_operand.vmem [shape: f32[32,128], index: 6, kind: input, shape index: {}]   ;;  %s2241_s1 = inlined_call_operand.vmem [shape: f32[8,32], index: 1, kind: input, shape index: {}]   ;;  %s2242_s4 = inlined_call_operand.vmem [shape: f32[1,32], index: 4, kind: input, shape index: {}]   ;;  %s2243_s7 = inlined_call_operand.vmem [shape: f32[1,128], index: 7, kind: input, shape index: {}]   ;;  %s2244_s2 = inlined_call_operand.vmem [shape: f32[8,32], index: 2, kind: input, shape index: {}]   ;;  %s2245_s8 = inlined_call_operand.vmem [shape: f32[32,32], index: 8, kind: input, shape index: {}]   ;;  %s2246_s9 = inlined_call_operand.vmem [shape: f32[1,32], index: 9, kind: input, shape index: {}]   ;;  %s2247_s10 = inlined_call_operand.vmem [shape: f32[1,1,32], index: 10, kind: input, shape index: {}]   ;;  %s2248_s13 = inlined_call_operand.vmem [shape: f32[8,32], index: 13, kind: output, shape index: {1}]   ;;  %s2249_s11 = inlined_call_operand.<no memory space> [shape: f32[1,1], index: 11, kind: input, shape index: {}]   ;;  %s2250_s14 = inlined_call_operand.vmem [shape: f32[8,32], index: 14, kind: output, shape index: {2}]   ;;  %s2251_s12 = inlined_call_operand.vmem [shape: f32[8,8], index: 12, kind: output, shape index: {0}]  }
   0x1   :  { %v54_v0 = vld [vmem:[%s2237_s3] sm:$0xff]  ;;  %v47_v2 = vld [vmem:[%s2238_s0 + $0x8] sm:$0xff]  ;;  %v48_v3 = vld [vmem:[%s2238_s0 + $0x10] sm:$0xff]  ;;  %v1887_v22 = vmov 0.0   ;;  %vm1459_vm3 = vcmask 1041409   ;;  %vm1461_vm4 = vcmask 1042434  }
   0x2   :  { %v46_v1 = vld [vmem:[%s2238_s0] sm:$0xff]  ;;  %1605 = vmatprep.subr.mxu0 %v54_v0  ;;  %1811 = vmatprep.subr.mxu1 %v54_v0  ;;  %v51_v5 = vld [vmem:[%s2238_s0 + $0x28] sm:$0xff]  ;;  %v52_v9 = vld [vmem:[%s2238_s0 + $0x30] sm:$0xff]  ;;  %vm1463_vm5 = vcmask 1043459   ;;  %vm1465_vm6 = vcmask 1044484   ;;  %vm1467_vm7 = vcmask 1045509  }
   0x3   :  { %1607 = vmatprep.mubr.msk.f32.mxu0 %vm62_vm0, %v46_v1  ;;  %v50_v4 = vld [vmem:[%s2238_s0 + $0x20] sm:$0xff]  ;;  %1606 = vmatpush3.msra.mxu0 %v54_v0  ;;  %v201_v7 = vld [vmem:[%s2239_s5 + $0x8] sm:$0xff]  ;;  %v49_v10 = vld [vmem:[%s2238_s0 + $0x18] sm:$0xff]  ;;  %vm1469_vm8 = vcmask 1046534   ;;  %vm1471_vm9 = vcmask 1047559  }
   0x4   :  { %v200_v6 = vld [vmem:[%s2239_s5] sm:$0xff]  ;;  %1608 = vmatmul.mubr.msk.f32.vlgmr.msra.gmra.mrb[0].mxu0 %vm62_vm0, %v47_v2  ;;  %1812 = vmatpush3.msra.mxu1 %v54_v0  ;;  %v53_v11 = vld [vmem:[%s2238_s0 + $0x38] sm:$0xff]  ;;  %v350_v13 = vld [vmem:[%s2240_s6 + $0x8] sm:$0xff] }
   0x5   :  { %v1747_v8 = vpack.c.bf16 %v201_v7, %v200_v6  ;;  %1610 = vmatprep.mubr.msk.f32.mxu0 %vm62_vm0, %v48_v3  ;;  %1613 = vmatprep.mubr.msk.f32.mxu1 %vm62_vm0, %v50_v4  ;;  %v349_v12 = vld [vmem:[%s2240_s6] sm:$0xff]  ;;  %v202_v14 = vld [vmem:[%s2239_s5 + $0x10] sm:$0xff]  ;;  %v203_v15 = vld [vmem:[%s2239_s5 + $0x18] sm:$0xff] }
   0x6   :  { %1614 = vmatmul.mubr.msk.f32.vlgmr.msra.gmra.mrb[0].mxu1 %vm62_vm0, %v51_v5  ;;  %v2020_v16 = vpack.c.bf16 %v350_v13, %v349_v12  ;;  %1755 = vmatprep.subr.bf16.mxu0 %v1885_v17  ;;  %v1751_v18 = vpack.c.bf16 %v203_v15, %v202_v14  ;;  %v351_v19 = vld [vmem:[%s2240_s6 + $0x10] sm:$0xff]  ;;  %v352_v20 = vld [vmem:[%s2240_s6 + $0x18] sm:$0xff]  ;;  %v353_v23 = vld [vmem:[%s2241_s1] sm:$0xff] }
   0x7   :  { %1748 = vmatprep.subr.bf16.mxu1 %v1747_v8  ;;  %1616 = vmatprep.mubr.msk.f32.mxu1 %vm62_vm0, %v52_v9  ;;  %v2031_v21 = vpack.c.bf16 %v352_v20, %v351_v19  ;;  %v1487_v24 = vld [vmem:[%s2242_s4] ss:$0 sm:$0xff] }
   0x8   :  { %1750 = vmatpush3.bf16.msra.mxu1 %v1747_v8  ;;  %1611 = vmatmul.mubr.msk.f32.gmra.mrb[2].mxu0 %vm62_vm0, %v49_v10  ;;  %v2068_v51 = vld [vmem:[%s2243_s7] ss:$0 sm:$0xff] }
   0x9   :  { %1757 = vmatpush3.bf16.msra.mxu0 %v2020_v16  ;;  %1752 = vmatprep.subr.bf16.mxu1 %v1751_v18  ;;  %v354_v61 = vld [vmem:[%s2244_s2] sm:$0xff] }
   0xa   :  { %1617 = vmatmul.mubr.msk.f32.gmra.mrb[2].mxu1 %vm62_vm0, %v53_v11  ;;  %1758 = vmatprep.subr.bf16.mxu0 %v1885_v17 }
   0xb   :  { %1647 = vmatprep.mubr.msk.f32.mxu0 %vm1886_vm2, %v1887_v22 }
   0xc   :  { %1754 = vmatpush3.bf16.msra.mxu1 %v1751_v18 }
   0xd   :  { %1761 = vmatprep.subr.bf16.mxu1 %v1885_v17  ;;  %1760 = vmatpush3.bf16.msra.mxu0 %v2031_v21 }
   0xe   :  { %1767 = vmatprep.subr.bf16.mxu0 %v1885_v17 }
  0x10   :  { %1648 = vmatmul.mubr.msk.f32.vlgmr.msra.gmra.mrb[4].mxu0 %vm211_vm1, %v353_v23 }
  0x11   :  { %1769 = vmatpush3.bf16.msra.mxu0 %v2020_v16  ;;  %1669 = vmatprep.mubr.msk.f32.mxu0 %vm1886_vm2, %v1887_v22 }
  0x12   :  { %1770 = vmatprep.subr.bf16.mxu0 %v1885_v17 }
  0x15   :  { %1772 = vmatpush3.bf16.msra.mxu0 %v2031_v21 }
  0x16   :  { %1779 = vmatprep.subr.bf16.mxu0 %v1885_v17 }
  0xd7   :  { %v1609_v25 = vpop.f32.mrb[0].mxu0 }
  0xd8   :  { %v159_v26 = vadd.f32 %v1609_v25, %v1487_v24  ;;  %v153_v27 = vpop.f32.mrb[1].mxu0 }
  0xd9   :  { %v154_v28 = vadd.f32 %v1487_v24, %v153_v27  ;;  %v1615_v29 = vpop.f32.mrb[0].mxu1 }
  0xda   :  { %v173_v30 = vpop.f32.mrb[1].mxu1  ;;  %v193_v34 = vmax.f32 %v159_v26, 0.0  ;;  %v179_v39 = vadd.f32 %v1615_v29, %v1487_v24 }
  0xdb   :  { %v192_v31 = vmax.f32 %v154_v28, 0.0  ;;  %v1612_v32 = vpop.f32.mrb[2].mxu0  ;;  %v174_v33 = vadd.f32 %v1487_v24, %v173_v30 }
  0xdc   :  { %v169_v35 = vadd.f32 %v1612_v32, %v1487_v24  ;;  %v163_v36 = vpop.f32.mrb[3].mxu0  ;;  %v197_v42 = vmax.f32 %v179_v39, 0.0 }
  0xdd   :  { %1627 = vmatprep.mubr.msk.f32.mxu1 %vm211_vm1, %v192_v31  ;;  %v164_v37 = vadd.f32 %v1487_v24, %v163_v36  ;;  %v196_v41 = vmax.f32 %v174_v33, 0.0  ;;  %v1618_v43 = vpop.f32.mrb[2].mxu1 }
  0xde   :  { %1628 = vmatmul.mubr.msk.f32.vlgmr.msra.gmra.mrb[4].mxu1 %vm211_vm1, %v193_v34  ;;  %v195_v38 = vmax.f32 %v169_v35, 0.0  ;;  %v189_v44 = vadd.f32 %v1618_v43, %v1487_v24  ;;  %v183_v45 = vpop.f32.mrb[3].mxu1 }
  0xdf   :  { %v194_v40 = vmax.f32 %v164_v37, 0.0  ;;  %1763 = vmatpush3.bf16.msra.mxu1 %v2020_v16  ;;  %v184_v46 = vadd.f32 %v1487_v24, %v183_v45 }
  0xe0   :  { %1764 = vmatprep.subr.bf16.mxu1 %v1885_v17  ;;  %v199_v47 = vmax.f32 %v189_v44, 0.0 }
  0xe1   :  { %1630 = vmatprep.mubr.msk.f32.mxu1 %vm211_vm1, %v194_v40  ;;  %v198_v48 = vmax.f32 %v184_v46, 0.0 }
  0xe2   :  { %1631 = vmatmul.mubr.msk.f32.gmra.mrb[6].mxu1 %vm211_vm1, %v195_v38 }
  0xe3   :  { %1633 = vmatprep.mubr.msk.f32.mxu1 %vm211_vm1, %v196_v41  ;;  %1766 = vmatpush3.bf16.msra.mxu1 %v2031_v21  ;;  %v425_v49 = vpop.f32.mrb[4].mxu0 }
  0xe4   :  { %1773 = vmatprep.subr.bf16.mxu1 %v1885_v17  ;;  %v1649_v50 = vpop.f32.mrb[5].mxu0 }
  0xe6   :  { %1634 = vmatmul.mubr.msk.f32.gmra.mrb[8].mxu1 %vm211_vm1, %v197_v42 }
  0xe7   :  { %1636 = vmatprep.mubr.msk.f32.mxu1 %vm211_vm1, %v198_v48 }
  0xea   :  { %1637 = vmatmul.mubr.msk.f32.gmra.mrb[10].mxu1 %vm211_vm1, %v199_v47 }
  0xeb   :  { %1658 = vmatprep.mubr.msk.f32.mxu1 %vm1886_vm2, %v1887_v22 }
 0x1b1   :  { %v1629_v52 = vpop.f32.mrb[4].mxu1 }
 0x1b2   :  { %v302_v53 = vpop.f32.mrb[5].mxu1  ;;  %v308_v14 = vadd.f32 %v1629_v52, %v2068_v51 }
 0x1b3   :  { %v303_v54 = vadd.f32 %v2068_v51, %v302_v53 }
 0x1b5   :  { %v429_v55 = vadd.f32 %v425_v49, %v303_v54  ;;  %v2071_v56 = vpop.f32.mrb[6].mxu1 }
 0x1b6   :  { %v2073_v57 = vpop.f32.mrb[7].mxu1 }
 0x1b7   :  { %1821 = vtanh.f32 %v429_v55  ;;  %v1506_v0 = vmul.f32 -1.442695, %v429_v55  ;;  %v313_v36 = vadd.f32 %v2068_v51, %v2073_v57  ;;  %v318_v55 = vadd.f32 %v2071_v56, %v2068_v51 }
 0x1b9   :  { %v2075_v58 = vpop.f32.mrb[8].mxu1  ;;  %1823 = vpow2.f32 %v1506_v0 }
 0x1ba   :  { %v2077_v59 = vpop.f32.mrb[9].mxu1 }
 0x1bd   :  { %v2084_v62 = vpop.f32.mrb[10].mxu1 }
 0x1be   :  { %v2086_v63 = vpop.f32.mrb[11].mxu1 }
 0x1c1   :  { %v1822_v60 = vpop.eup %1821 }
 0x1c2   :  { %443 = vrot.lane.b32.xlu0 %v1822_v60, %s1888_s30 }
 0x1c3   :  { %v1824_v1 = vpop.eup %1823 }
 0x1c4   :  { %v433_v2 = vadd.f32 1.0, %v1824_v1 }
 0x1c6   :  { %438 = vrot.lane.b32.xlu0 %v354_v61, %s1889_s16  ;;  %1825 = vrcp.f32 %v433_v2 }
 0x1d0   :  { %v1826_v3 = vpop.eup %1825 }
 0x234   :  { %v444_v4 = vpop.permute.xlu0 %443 }
 0x235   :  { %v446_v5 = vmul.f32 %v1826_v3, %v444_v4 }
 0x237   :  { %448 = vrot.lane.b32.xlu1 %v446_v5, %s1889_s16 }
 0x238   :  { %v439_v6 = vpop.permute.xlu0 %438 }
 0x239   :  { %v441_v7 = vmul.f32 %v1826_v3, %v439_v6 }
 0x2a9   :  { %v449_v8 = vpop.permute.xlu1 %448 }
 0x2aa   :  { %v451_v9 = vadd.f32 %v449_v8, %v441_v7 }
 0x2ac   :  { %1827 = vtanh.f32 %v451_v9 }
 0x2b6   :  { %v1828_v10 = vpop.eup %1827 }
 0x2b7   :  { %454 = vrot.lane.b32.xlu1 %v1828_v10, %s1888_s30 }
 0x329   :  { %v455_v11 = vpop.permute.xlu1 %454 }
 0x32a   :  { %v457_v12 = vmul.f32 %v1826_v3, %v455_v11 }
 0x32c   :  { %459 = vrot.lane.b32.xlu0 %v457_v12, %s1889_s16 }
 0x39e   :  { %v460_v13 = vpop.permute.xlu0 %459 }
 0x39f   :  { %462 = vst.msk [vmem:[#allocation3] sm:$0xff] %vm211_vm1, %v460_v13  ;;  %1659 = vmatmul.mubr.msk.f32.vlgmr.msra.gmra.mrb[12].mxu1 %vm211_vm1, %v460_v13  ;;  %v323_v13 = vadd.f32 %v2068_v51, %v2077_v59 }
 0x3a0   :  { %1775 = vmatpush3.bf16.msra.mxu1 %v2020_v16  ;;  %1680 = vmatprep.mubr.msk.f32.mxu1 %vm1886_vm2, %v1887_v22 }
 0x3a1   :  { %1776 = vmatprep.subr.bf16.mxu1 %v1885_v17 }
 0x3a4   :  { %1778 = vmatpush3.bf16.msra.mxu1 %v2031_v21 }
 0x3a5   :  { %1785 = vmatprep.subr.bf16.mxu1 %v1885_v17 }
 0x472   :  { %v533_v15 = vpop.f32.mrb[12].mxu1 }
 0x473   :  { %v537_v18 = vadd.f32 %v533_v15, %v308_v14  ;;  %v1660_v19 = vpop.f32.mrb[13].mxu1 }
 0x475   :  { %1829 = vtanh.f32 %v537_v18  ;;  %v1508_v23 = vmul.f32 -1.442695, %v537_v18 }
 0x477   :  { %1831 = vpow2.f32 %v1508_v23 }
 0x47f   :  { %v1830_v20 = vpop.eup %1829 }
 0x480   :  { %547 = vrot.lane.b32.xlu1 %v1830_v20, %s1888_s30 }
 0x481   :  { %v1832_v24 = vpop.eup %1831 }
 0x482   :  { %v541_v25 = vadd.f32 1.0, %v1832_v24 }
 0x484   :  { %1833 = vrcp.f32 %v541_v25 }
 0x48e   :  { %v1834_v26 = vpop.eup %1833 }
 0x48f   :  { %v545_v29 = vmul.f32 %v1834_v26, %v451_v9 }
 0x4f2   :  { %v548_v27 = vpop.permute.xlu1 %547 }
 0x4f3   :  { %v550_v28 = vmul.f32 %v1834_v26, %v548_v27 }
 0x4f5   :  { %552 = vrot.lane.b32.xlu0 %v550_v28, %s1889_s16 }
 0x567   :  { %v553_v30 = vpop.permute.xlu0 %552 }
 0x568   :  { %v555_v31 = vadd.f32 %v553_v30, %v545_v29 }
 0x56a   :  { %1835 = vtanh.f32 %v555_v31 }
 0x574   :  { %v1836_v32 = vpop.eup %1835 }
 0x575   :  { %558 = vrot.lane.b32.xlu1 %v1836_v32, %s1888_s30 }
 0x5e7   :  { %v559_v33 = vpop.permute.xlu1 %558 }
 0x5e8   :  { %v561_v34 = vmul.f32 %v1834_v26, %v559_v33 }
 0x5ea   :  { %563 = vrot.lane.b32.xlu0 %v561_v34, %s1889_s16  ;;  %v328_v34 = vadd.f32 %v2075_v58, %v2068_v51 }
 0x65c   :  { %v564_v35 = vpop.permute.xlu0 %563 }
 0x65d   :  { %567 = vst.msk [vmem:[#allocation3 + $0x8] sm:$0xff] %vm211_vm1, %v564_v35  ;;  %1670 = vmatmul.mubr.msk.f32.vlgmr.msra.gmra.mrb[6].mxu0 %vm211_vm1, %v564_v35 }
 0x65e   :  { %1781 = vmatpush3.bf16.msra.mxu0 %v2020_v16  ;;  %1691 = vmatprep.mubr.msk.f32.mxu0 %vm1886_vm2, %v1887_v22 }
 0x65f   :  { %1782 = vmatprep.subr.bf16.mxu0 %v1885_v17 }
 0x662   :  { %1784 = vmatpush3.bf16.msra.mxu0 %v2031_v21 }
 0x663   :  { %1791 = vmatprep.subr.bf16.mxu0 %v1885_v17 }
 0x730   :  { %v638_v37 = vpop.f32.mrb[6].mxu0 }
 0x731   :  { %v642_v38 = vadd.f32 %v638_v37, %v313_v36  ;;  %v1671_v39 = vpop.f32.mrb[7].mxu0 }
 0x733   :  { %1837 = vtanh.f32 %v642_v38  ;;  %v1510_v41 = vmul.f32 -1.442695, %v642_v38 }
 0x735   :  { %1839 = vpow2.f32 %v1510_v41 }
 0x73d   :  { %v1838_v40 = vpop.eup %1837 }
 0x73e   :  { %652 = vrot.lane.b32.xlu1 %v1838_v40, %s1888_s30 }
 0x73f   :  { %v1840_v42 = vpop.eup %1839 }
 0x740   :  { %v646_v43 = vadd.f32 1.0, %v1840_v42 }
 0x742   :  { %1841 = vrcp.f32 %v646_v43  ;;  %v1212_v43 = vld [vmem:[%s2245_s8] sm:$0xff] }
 0x74c   :  { %v1842_v44 = vpop.eup %1841 }
 0x74d   :  { %v650_v47 = vmul.f32 %v1842_v44, %v555_v31 }
 0x7b0   :  { %v653_v45 = vpop.permute.xlu1 %652 }
 0x7b1   :  { %v655_v46 = vmul.f32 %v1842_v44, %v653_v45 }
 0x7b3   :  { %657 = vrot.lane.b32.xlu0 %v655_v46, %s1889_s16 }
 0x825   :  { %v658_v48 = vpop.permute.xlu0 %657 }
 0x826   :  { %v660_v49 = vadd.f32 %v658_v48, %v650_v47 }
 0x828   :  { %1843 = vtanh.f32 %v660_v49 }
 0x832   :  { %v1844_v50 = vpop.eup %1843 }
 0x833   :  { %663 = vrot.lane.b32.xlu1 %v1844_v50, %s1888_s30  ;;  %v1215_v50 = vld [vmem:[%s2245_s8 + $0x18] sm:$0xff] }
 0x8a5   :  { %v664_v52 = vpop.permute.xlu1 %663 }
 0x8a6   :  { %v666_v53 = vmul.f32 %v1842_v44, %v664_v52  ;;  %v1213_v44 = vld [vmem:[%s2245_s8 + $0x8] sm:$0xff] }
 0x8a7   :  { %v1803_v45 = vpack.c.bf16 %v1213_v44, %v1212_v43 }
 0x8a8   :  { %668 = vrot.lane.b32.xlu0 %v666_v53, %s1889_s16 }
 0x91a   :  { %v669_v54 = vpop.permute.xlu0 %668 }
 0x91b   :  { %672 = vst.msk [vmem:[#allocation3 + $0x10] sm:$0xff] %vm211_vm1, %v669_v54  ;;  %1681 = vmatmul.mubr.msk.f32.vlgmr.msra.gmra.mrb[14].mxu1 %vm211_vm1, %v669_v54  ;;  %v1204_v54 = vld [vmem:[#allocation3] sm:$0xff] }
 0x91c   :  { %1787 = vmatpush3.bf16.msra.mxu1 %v2020_v16  ;;  %1702 = vmatprep.mubr.msk.f32.mxu1 %vm1886_vm2, %v1887_v22 }
 0x91d   :  { %1788 = vmatprep.subr.bf16.mxu1 %v1885_v17 }
 0x920   :  { %1790 = vmatpush3.bf16.msra.mxu1 %v2031_v21 }
 0x921   :  { %1797 = vmatprep.subr.bf16.mxu1 %v1885_v17 }
 0x9ee   :  { %v743_v57 = vpop.f32.mrb[14].mxu1 }
 0x9ef   :  { %v747_v60 = vadd.f32 %v743_v57, %v318_v55  ;;  %v1682_v61 = vpop.f32.mrb[15].mxu1  ;;  %v1205_v55 = vld [vmem:[#allocation3 + $0x8] sm:$0xff]  ;;  %v1206_v57 = vld [vmem:[#allocation3 + $0x10] sm:$0xff] }
 0x9f1   :  { %1845 = vtanh.f32 %v747_v60  ;;  %v1512_v1 = vmul.f32 -1.442695, %v747_v60 }
 0x9f3   :  { %1847 = vpow2.f32 %v1512_v1  ;;  %v333_v1 = vadd.f32 %v2068_v51, %v2086_v63 }
 0x9fb   :  { %v1846_v0 = vpop.eup %1845 }
 0x9fc   :  { %757 = vrot.lane.b32.xlu1 %v1846_v0, %s1888_s30 }
 0x9fd   :  { %v1848_v2 = vpop.eup %1847 }
 0x9fe   :  { %v751_v3 = vadd.f32 1.0, %v1848_v2 }
 0xa00   :  { %1849 = vrcp.f32 %v751_v3 }
 0xa0a   :  { %v1850_v4 = vpop.eup %1849 }
 0xa0b   :  { %v755_v7 = vmul.f32 %v1850_v4, %v660_v49  ;;  %v1214_v49 = vld [vmem:[%s2245_s8 + $0x10] sm:$0xff] }
 0xa0c   :  { %v1807_v52 = vpack.c.bf16 %v1215_v50, %v1214_v49 }
 0xa6e   :  { %v758_v5 = vpop.permute.xlu1 %757 }
 0xa6f   :  { %v760_v6 = vmul.f32 %v1850_v4, %v758_v5 }
 0xa71   :  { %762 = vrot.lane.b32.xlu0 %v760_v6, %s1889_s16 }
 0xae3   :  { %v763_v8 = vpop.permute.xlu0 %762 }
 0xae4   :  { %v765_v56 = vadd.f32 %v763_v8, %v755_v7 }
 0xae6   :  { %1851 = vtanh.f32 %v765_v56 }
 0xaf0   :  { %v1852_v9 = vpop.eup %1851 }
 0xaf1   :  { %768 = vrot.lane.b32.xlu1 %v1852_v9, %s1888_s30 }
 0xb63   :  { %v769_v10 = vpop.permute.xlu1 %768 }
 0xb64   :  { %v771_v11 = vmul.f32 %v1850_v4, %v769_v10 }
 0xb66   :  { %773 = vrot.lane.b32.xlu0 %v771_v11, %s1889_s16 }
 0xbd8   :  { %v774_v12 = vpop.permute.xlu0 %773 }
 0xbd9   :  { %777 = vst.msk [vmem:[#allocation3 + $0x18] sm:$0xff] %vm211_vm1, %v774_v12  ;;  %1692 = vmatmul.mubr.msk.f32.vlgmr.msra.gmra.mrb[8].mxu0 %vm211_vm1, %v774_v12 }
 0xbda   :  { %1793 = vmatpush3.bf16.msra.mxu0 %v2020_v16  ;;  %1713 = vmatprep.mubr.msk.f32.mxu0 %vm1886_vm2, %v1887_v22 }
 0xbdb   :  { %1794 = vmatprep.subr.bf16.mxu0 %v1885_v17 }
 0xbde   :  { %1796 = vmatpush3.bf16.msra.mxu0 %v2031_v21 }
 0xbdf   :  { %1804 = vmatprep.subr.bf16.mxu0 %v1803_v45 }
 0xbe0   :  { %v1207_v60 = vld [vmem:[#allocation3 + $0x18] sm:$0xff] }
 0xcac   :  { %v848_v14 = vpop.f32.mrb[8].mxu0 }
 0xcad   :  { %v852_v15 = vadd.f32 %v848_v14, %v323_v13  ;;  %v1693_v18 = vpop.f32.mrb[9].mxu0 }
 0xcaf   :  { %1853 = vtanh.f32 %v852_v15  ;;  %v1514_v20 = vmul.f32 -1.442695, %v852_v15 }
 0xcb1   :  { %1855 = vpow2.f32 %v1514_v20 }
 0xcb9   :  { %v1854_v19 = vpop.eup %1853 }
 0xcba   :  { %862 = vrot.lane.b32.xlu1 %v1854_v19, %s1888_s30 }
 0xcbb   :  { %v1856_v23 = vpop.eup %1855 }
 0xcbc   :  { %v856_v24 = vadd.f32 1.0, %v1856_v23 }
 0xcbe   :  { %1857 = vrcp.f32 %v856_v24 }
 0xcc8   :  { %v1858_v25 = vpop.eup %1857 }
 0xcc9   :  { %v860_v28 = vmul.f32 %v1858_v25, %v765_v56 }
 0xd2c   :  { %v863_v26 = vpop.permute.xlu1 %862 }
 0xd2d   :  { %v865_v27 = vmul.f32 %v1858_v25, %v863_v26 }
 0xd2f   :  { %867 = vrot.lane.b32.xlu0 %v865_v27, %s1889_s16 }
 0xda1   :  { %v868_v29 = vpop.permute.xlu0 %867 }
 0xda2   :  { %v870_v59 = vadd.f32 %v868_v29, %v860_v28  ;;  %v338_v28 = vadd.f32 %v2084_v62, %v2068_v51 }
 0xda4   :  { %1859 = vtanh.f32 %v870_v59 }
 0xdae   :  { %v1860_v30 = vpop.eup %1859 }
 0xdaf   :  { %873 = vrot.lane.b32.xlu1 %v1860_v30, %s1888_s30 }
 0xe21   :  { %v874_v31 = vpop.permute.xlu1 %873 }
 0xe22   :  { %v876_v32 = vmul.f32 %v1858_v25, %v874_v31 }
 0xe24   :  { %878 = vrot.lane.b32.xlu0 %v876_v32, %s1889_s16 }
 0xe96   :  { %v879_v33 = vpop.permute.xlu0 %878 }
 0xe97   :  { %882 = vst.msk [vmem:[#allocation3 + $0x20] sm:$0xff] %vm211_vm1, %v879_v33  ;;  %1703 = vmatmul.mubr.msk.f32.vlgmr.msra.gmra.mrb[16].mxu1 %vm211_vm1, %v879_v33 }
 0xe98   :  { %1799 = vmatpush3.bf16.msra.mxu1 %v2020_v16  ;;  %1724 = vmatprep.mubr.msk.f32.mxu1 %vm1886_vm2, %v1887_v22 }
 0xe99   :  { %1800 = vmatprep.subr.bf16.mxu1 %v1885_v17 }
 0xe9c   :  { %1802 = vmatpush3.bf16.msra.mxu1 %v2031_v21 }
 0xe9e   :  { %v1208_v61 = vld [vmem:[#allocation3 + $0x20] sm:$0xff] }
 0xf6a   :  { %v953_v35 = vpop.f32.mrb[16].mxu1 }
 0xf6b   :  { %v957_v36 = vadd.f32 %v953_v35, %v328_v34  ;;  %v1704_v37 = vpop.f32.mrb[17].mxu1 }
 0xf6d   :  { %1861 = vtanh.f32 %v957_v36  ;;  %v1516_v39 = vmul.f32 -1.442695, %v957_v36 }
 0xf6f   :  { %1863 = vpow2.f32 %v1516_v39 }
 0xf77   :  { %v1862_v38 = vpop.eup %1861 }
 0xf78   :  { %967 = vrot.lane.b32.xlu1 %v1862_v38, %s1888_s30 }
 0xf79   :  { %v1864_v16 = vpop.eup %1863 }
 0xf7a   :  { %v961_v40 = vadd.f32 1.0, %v1864_v16  ;;  %v1521_v16 = vld [vmem:[%s2246_s9] ss:$0 sm:$0xff] }
 0xf7c   :  { %1865 = vrcp.f32 %v961_v40 }
 0xf86   :  { %v1866_v22 = vpop.eup %1865 }
 0xf87   :  { %v965_v21 = vmul.f32 %v1866_v22, %v870_v59 }
 0xfea   :  { %v968_v41 = vpop.permute.xlu1 %967 }
 0xfeb   :  { %v970_v17 = vmul.f32 %v1866_v22, %v968_v41 }
 0xfed   :  { %972 = vrot.lane.b32.xlu0 %v970_v17, %s1889_s16  ;;  %v1530_v17 = vld [vmem:[%s2247_s10] ss:$0 sm:$0xff] }
0x105f   :  { %v973_v42 = vpop.permute.xlu0 %972 }
0x1060   :  { %v975_v58 = vadd.f32 %v973_v42, %v965_v21 }
0x1062   :  { %1867 = vtanh.f32 %v975_v58 }
0x106c   :  { %v1868_v46 = vpop.eup %1867 }
0x106d   :  { %978 = vrot.lane.b32.xlu1 %v1868_v46, %s1888_s30 }
0x10df   :  { %v979_v47 = vpop.permute.xlu1 %978 }
0x10e0   :  { %v981_v48 = vmul.f32 %v1866_v22, %v979_v47 }
0x10e2   :  { %983 = vrot.lane.b32.xlu0 %v981_v48, %s1889_s16 }
0x1154   :  { %v984_v53 = vpop.permute.xlu0 %983 }
0x1155   :  { %987 = vst.msk [vmem:[#allocation3 + $0x28] sm:$0xff] %vm211_vm1, %v984_v53  ;;  %1714 = vmatmul.mubr.msk.f32.vlgmr.msra.gmra.mrb[10].mxu0 %vm211_vm1, %v984_v53 }
0x1156   :  { %1806 = vmatpush3.bf16.msra.mxu0 %v1803_v45  ;;  %1735 = vmatprep.mubr.msk.f32.mxu0 %vm211_vm1, %v1204_v54 }
0x1157   :  { %1808 = vmatprep.subr.bf16.mxu0 %v1807_v52 }
0x115a   :  { %1810 = vmatpush3.bf16.msra.mxu0 %v1807_v52 }
0x115c   :  { %v1209_v0 = vld [vmem:[#allocation3 + $0x28] sm:$0xff] }
0x115d   :  { %1736 = vmatmul.mubr.msk.f32.vlgmr.msra.gmra.mrb[12].mxu0 %vm211_vm1, %v1205_v55 }
0x115e   :  { %1738 = vmatprep.mubr.msk.f32.mxu0 %vm211_vm1, %v1206_v57 }
0x1161   :  { %1739 = vmatmul.mubr.msk.f32.gmra.mrb[14].mxu0 %vm211_vm1, %v1207_v60 }
0x1162   :  { %1741 = vmatprep.mubr.msk.f32.mxu0 %vm211_vm1, %v1208_v61 }
0x1165   :  { %1742 = vmatmul.mubr.msk.f32.gmra.mrb[16].mxu0 %vm211_vm1, %v1209_v0 }
0x1228   :  { %v1058_v2 = vpop.f32.mrb[10].mxu0 }
0x1229   :  { %v1062_v3 = vadd.f32 %v1058_v2, %v333_v1  ;;  %v1715_v4 = vpop.f32.mrb[11].mxu0 }
0x122b   :  { %1869 = vtanh.f32 %v1062_v3  ;;  %v1518_v11 = vmul.f32 -1.442695, %v1062_v3 }
0x122d   :  { %1871 = vpow2.f32 %v1518_v11 }
0x1230   :  { %v2180_v5 = vpop.f32.mrb[12].mxu0 }
0x1231   :  { %v1313_v6 = vpop.f32.mrb[13].mxu0  ;;  %v1319_v52 = vadd.f32 %v2180_v5, %v1521_v16 }
0x1232   :  { %v1314_v40 = vadd.f32 %v1521_v16, %v1313_v6 }
0x1233   :  { %v1353_v53 = vmax.f32 %v1319_v52, 0.0 }
0x1234   :  { %v1740_v7 = vpop.f32.mrb[14].mxu0  ;;  %v1352_v22 = vmax.f32 %v1314_v40, 0.0 }
0x1235   :  { %v1870_v8 = vpop.eup %1869  ;;  %v2182_v56 = vpop.f32.mrb[15].mxu0  ;;  %v1329_v41 = vadd.f32 %v1740_v7, %v1521_v16  ;;  %v1368_v60 = vmul.f32 %v1530_v17, %v1353_v53  ;;  %v20_v7 = vstv %s2249_s11 }
0x1236   :  { %1072 = vrot.lane.b32.xlu1 %v1870_v8, %s1888_s30  ;;  %v1324_v54 = vadd.f32 %v1521_v16, %v2182_v56  ;;  %21 = vst [vmem:[#allocation4] sm:$0x1] %v20_v7  ;;  %v1890_v8 = vmov 0  }
0x1237   :  { %v1872_v12 = vpop.eup %1871  ;;  %v1355_v21 = vmax.f32 %v1329_v41, 0.0  ;;  %v1378_v0 = vsel %vm211_vm1, %v1368_v60, 0.0  ;;  %1820 = vset.pattern.permute.xlu0 %v1890_v8 }
0x1238   :  { %v1743_v9 = vpop.f32.mrb[16].mxu0  ;;  %v1066_v63 = vadd.f32 1.0, %v1872_v12  ;;  %v1354_v55 = vmax.f32 %v1324_v54, 0.0 }
0x1239   :  { %v2185_v10 = vpop.f32.mrb[17].mxu0  ;;  %v1339_v42 = vadd.f32 %v1743_v9, %v1521_v16  ;;  %v1370_v45 = vmul.f32 %v1530_v17, %v1355_v21 }
0x123a   :  { %1873 = vrcp.f32 %v1066_v63  ;;  %v1334_v57 = vadd.f32 %v1521_v16, %v2185_v10  ;;  %v1369_v1 = vmul.f32 %v1530_v17, %v1354_v55 }
0x123b   :  { %v1357_v43 = vmax.f32 %v1339_v42, 0.0  ;;  %v1384_v46 = vsel %vm211_vm1, %v1370_v45, 0.0 }
0x123c   :  { %v1356_v61 = vmax.f32 %v1334_v57, 0.0  ;;  %v1381_v2 = vsel %vm211_vm1, %v1369_v1, 0.0 }
0x123d   :  { %v1372_v47 = vmul.f32 %v1530_v17, %v1357_v43 }
0x123e   :  { %v1371_v3 = vmul.f32 %v1530_v17, %v1356_v61 }
0x123f   :  { %v1390_v48 = vsel %vm211_vm1, %v1372_v47, 0.0 }
0x1240   :  { %v1387_v4 = vsel %vm211_vm1, %v1371_v3, 0.0 }
0x1244   :  { %v1874_v13 = vpop.eup %1873 }
0x1245   :  { %v1070_v18 = vmul.f32 %v1874_v13, %v975_v58  ;;  %v1367_v58 = vmul.f32 %v1530_v17, %v1352_v22 }
0x1247   :  { %v1375_v44 = vsel %vm211_vm1, %v1367_v58, 0.0 }
0x12a8   :  { %v1073_v14 = vpop.permute.xlu1 %1072 }
0x12a9   :  { %v1075_v15 = vmul.f32 %v1874_v13, %v1073_v14 }
0x12ab   :  { %1077 = vrot.lane.b32.xlu0 %v1075_v15, %s1889_s16 }
0x131d   :  { %v1078_v19 = vpop.permute.xlu0 %1077 }
0x131e   :  { %v1080_v20 = vadd.f32 %v1078_v19, %v1070_v18  ;;  %v1531_v19 = vld [vmem:[#allocation4] ss:$0 sm:$0xff] }
0x1320   :  { %1875 = vtanh.f32 %v1080_v20 }
0x132a   :  { %v1876_v23 = vpop.eup %1875 }
0x132b   :  { %1083 = vrot.lane.b32.xlu1 %v1876_v23, %s1888_s30 }
0x139d   :  { %v1084_v24 = vpop.permute.xlu1 %1083 }
0x139e   :  { %v1086_v25 = vmul.f32 %v1874_v13, %v1084_v24 }
0x13a0   :  { %1088 = vrot.lane.b32.xlu0 %v1086_v25, %s1889_s16 }
0x1412   :  { %v1089_v26 = vpop.permute.xlu0 %1088 }
0x1413   :  { %1092 = vst.msk [vmem:[#allocation3 + $0x30] sm:$0xff] %vm211_vm1, %v1089_v26  ;;  %1725 = vmatmul.mubr.msk.f32.vlgmr.msra.gmra.mrb[18].mxu1 %vm211_vm1, %v1089_v26 }
0x141a   :  { %v1210_v27 = vld [vmem:[#allocation3 + $0x30] sm:$0xff] }
0x141b   :  { %1744 = vmatprep.mubr.msk.f32.mxu0 %vm211_vm1, %v1210_v27 }
0x14e6   :  { %v1163_v29 = vpop.f32.mrb[18].mxu1 }
0x14e7   :  { %v1167_v59 = vadd.f32 %v1163_v29, %v338_v28  ;;  %v1726_v30 = vpop.f32.mrb[19].mxu1  ;;  %v1425_v28 = vlaneseq }
0x14e9   :  { %1877 = vtanh.f32 %v1167_v59  ;;  %v1520_v32 = vmul.f32 -1.442695, %v1167_v59  ;;  %v1426_v30 = vand.u32 127, %v1425_v28 }
0x14eb   :  { %1879 = vpow2.f32 %v1520_v32 }
0x14f3   :  { %v1878_v31 = vpop.eup %1877 }
0x14f4   :  { %1177 = vrot.lane.b32.xlu1 %v1878_v31, %s1888_s30  ;;  %v1428_v31 = vshrl.u32 %v1425_v28, 7 }
0x14f5   :  { %v1880_v33 = vpop.eup %1879 }
0x14f6   :  { %v1171_v34 = vadd.f32 1.0, %v1880_v33  ;;  %v1429_v33 = vsub.s32 %v1426_v30, %v1428_v31 }
0x14f8   :  { %1881 = vrcp.f32 %v1171_v34 }
0x1502   :  { %v1882_v35 = vpop.eup %1881 }
0x1503   :  { %v1175_v38 = vmul.f32 %v1882_v35, %v1080_v20 }
0x1566   :  { %v1178_v36 = vpop.permute.xlu1 %1177 }
0x1567   :  { %v1180_v37 = vmul.f32 %v1882_v35, %v1178_v36 }
0x1569   :  { %1182 = vrot.lane.b32.xlu0 %v1180_v37, %s1889_s16 }
0x15db   :  { %v1183_v39 = vpop.permute.xlu0 %1182 }
0x15dc   :  { %v2197_v51 = vadd.f32 %v1183_v39, %v1175_v38 }
0x15de   :  { %1883 = vtanh.f32 %v2197_v51 }
0x15e8   :  { %v1884_v62 = vpop.eup %1883 }
0x15e9   :  { %1188 = vrot.lane.b32.xlu1 %v1884_v62, %s1888_s30 }
0x160d   :  { %1376 = vadd.xlane.f32.xlu1 %v1375_v44 }
0x1611   :  { %1385 = vadd.xlane.f32.xlu1 %v1384_v46 }
0x1615   :  { %1391 = vadd.xlane.f32.xlu1 %v1390_v48 }
0x165b   :  { %v1189_v49 = vpop.permute.xlu1 %1188 }
0x165c   :  { %v1191_v50 = vmul.f32 %v1882_v35, %v1189_v49 }
0x165e   :  { %1193 = vrot.lane.b32.xlu0 %v1191_v50, %s1889_s16 }
0x167d   :  { %1379 = vadd.xlane.f32.xlu0 %v1378_v0 }
0x1681   :  { %1382 = vadd.xlane.f32.xlu0 %v1381_v2 }
0x1685   :  { %1388 = vadd.xlane.f32.xlu0 %v1387_v4 }
0x169a   :  { %v1377_v20 = vpop.xlane.xlu1 %1376 }
0x169e   :  { %v1386_v24 = vpop.xlane.xlu1 %1385 }
0x16a2   :  { %v1392_v26 = vpop.xlane.xlu1 %1391 }
0x16d0   :  { %v1194_v5 = vpop.permute.xlu0 %1193 }
0x16d1   :  { %1197 = vst.msk [vmem:[#allocation3 + $0x38] sm:$0xff] %vm211_vm1, %v1194_v5  ;;  %1198 = vst.msk [vmem:[%s2248_s13] sm:$0xff] %vm211_vm1, %v1194_v5  ;;  %s1891_s13 = smov 96  }
0x16d8   :  { %v1211_v6 = vld [vmem:[#allocation3 + $0x38] sm:$0xff] }
0x16d9   :  { %1745 = vmatmul.mubr.msk.f32.gmra.mrb[18].mxu0 %vm211_vm1, %v1211_v6 }
0x170a   :  { %v1380_v23 = vpop.xlane.xlu0 %1379 }
0x170e   :  { %v1383_v25 = vpop.xlane.xlu0 %1382 }
0x1712   :  { %v1389_v29 = vpop.xlane.xlu0 %1388 }
0x17ac   :  { %v1746_v56 = vpop.f32.mrb[18].mxu0 }
0x17ad   :  { %v1349_v9 = vadd.f32 %v1746_v56, %v1521_v16  ;;  %v1343_v10 = vpop.f32.mrb[19].mxu0 }
0x17ae   :  { %v1344_v11 = vadd.f32 %v1521_v16, %v1343_v10 }
0x17af   :  { %v1359_v12 = vmax.f32 %v1349_v9, 0.0 }
0x17b0   :  { %v1358_v63 = vmax.f32 %v1344_v11, 0.0 }
0x17b1   :  { %v1374_v13 = vmul.f32 %v1530_v17, %v1359_v12 }
0x17b2   :  { %v1373_v14 = vmul.f32 %v1530_v17, %v1358_v63 }
0x17b3   :  { %v1396_v15 = vsel %vm211_vm1, %v1374_v13, 0.0 }
0x17b4   :  { %1397 = vadd.xlane.f32.xlu1 %v1396_v15  ;;  %v1393_v18 = vsel %vm211_vm1, %v1373_v14, 0.0 }
0x17b5   :  { %1394 = vadd.xlane.f32.xlu0 %v1393_v18 }
0x17c5   :  { %1200 = vrot.lane.b32.xlu1 %v2197_v51, %s1891_s13 }
0x17cb   :  { %1406 = vperm.xlu0 %1820, %v1531_v19  }
0x1841   :  { %v1398_v27 = vpop.xlane.xlu1 %1397 }
0x1842   :  { %v1395_v32 = vpop.xlane.xlu0 %1394 }
0x1845   :  { %v1201_v59 = vpop.permute.xlu1 %1200 }
0x1846   :  { %1203 = vst.msk [vmem:[%s2250_s14] sm:$0xff] %vm211_vm1, %v1201_v59 }
0x184a   :  { %v1407_v34 = vpop.permute.xlu0 %1406 }
0x184b   :  { %v1409_v35 = vadd.f32 %v1407_v34, %v1377_v20  ;;  %v1410_v36 = vadd.f32 %v1407_v34, %v1380_v23  ;;  %v1411_v37 = vadd.f32 %v1407_v34, %v1383_v25  ;;  %v1412_v38 = vadd.f32 %v1407_v34, %v1386_v24 }
0x184c   :  { %v1413_v39 = vadd.f32 %v1407_v34, %v1389_v29  ;;  %v1414_v51 = vadd.f32 %v1407_v34, %v1392_v26  ;;  %v1415_v22 = vadd.f32 %v1407_v34, %v1395_v32  ;;  %v1416_v41 = vadd.f32 %v1407_v34, %v1398_v27 }
0x184d   :  { %v1430_v62 = vrot.slane %v1409_v35, %v1429_v33  ;;  %v1434_v16 = vrot.slane %v1410_v36, %v1429_v33  ;;  %v1438_v40 = vrot.slane %v1411_v37, %v1429_v33  ;;  %v1442_v17 = vrot.slane %v1412_v38, %v1429_v33 }
0x184e   :  { %v1446_v42 = vrot.slane %v1413_v39, %v1429_v33  ;;  %v1450_v43 = vrot.slane %v1414_v51, %v1429_v33  ;;  %v1454_v45 = vrot.slane %v1415_v22, %v1429_v33  ;;  %v1458_v47 = vrot.slane %v1416_v41, %v1429_v33 }
0x184f   :  { %v1460_v21 = vsel %vm1459_vm3, %v1434_v16, %v1430_v62 }
0x1850   :  { %v1462_v58 = vsel %vm1461_vm4, %v1438_v40, %v1460_v21 }
0x1851   :  { %v1464_v44 = vsel %vm1463_vm5, %v1442_v17, %v1462_v58 }
0x1852   :  { %v1466_v46 = vsel %vm1465_vm6, %v1446_v42, %v1464_v44 }
0x1853   :  { %v1468_v48 = vsel %vm1467_vm7, %v1450_v43, %v1466_v46 }
0x1854   :  { %v1470_v49 = vsel %vm1469_vm8, %v1454_v45, %v1468_v48 }
0x1855   :  { %v1472_v50 = vsel %vm1471_vm9, %v1458_v47, %v1470_v49 }
0x1856   :  { %1474 = vst.msk [vmem:[%s2251_s12] sm:$0xff] %vm62_vm0, %v1472_v50 }

</bundles_post_ra>
